<compile_context>
chip_gen: v6e
topology: v6e:2x2x1
jax: 0.10.0
libtpu: 0.0.40
codegen_flags: <defaults>
</compile_context>

<pallas_src>
import jax
import jax.numpy as jnp
from jax.experimental import pallas as pl
from jax.experimental.pallas import tpu as pltpu


def _multihead_kernel(x_ref, ws_ref, bs_ref, wh_ref, bh_ref, y_ref):
    # shared = x @ Ws + bs            -> (TILE_B, 128), fp32 MXU accumulation
    h = jnp.dot(x_ref[...], ws_ref[...],
                preferred_element_type=jnp.float32) + bs_ref[...]
    # fused heads: y = h @ [W1 | W2 | 0] + [b1 | b2 | 0]   -> (TILE_B, 128)
    # (cast h to the weight dtype so the bf16 path keeps the fast MXU route;
    #  fp32 path makes this a no-op)
    y_ref[...] = (jnp.dot(h.astype(wh_ref.dtype), wh_ref[...],
                          preferred_element_type=jnp.float32)
                  + bh_ref[...]).astype(y_ref.dtype)


def multihead_forward(x, ws, bs, w1, b1, w2, b2, *, tile_b=256,
                      compute_dtype=jnp.float32):
    """x: [B, in]; ws: [in, 128]; bs: [1, 128]; w1: [128, out1]; w2: [128, out2].
    Returns (y1, y2) in fp32 with shapes [B, out1], [B, out2]."""
    B, in_features = x.shape
    hidden = ws.shape[1]
    out1, out2 = w1.shape[1], w2.shape[1]
    out_total = out1 + out2
    out_pad = max(128, -(-out_total // 128) * 128)   # lane-dense output slab

    cdt = jnp.dtype(compute_dtype)

    # --- wrapper-side preprocessing: fuse + zero-pad head weights/biases ---
    wh = jnp.zeros((hidden, out_pad), cdt)
    wh = wh.at[:, :out1].set(w1.astype(cdt))
    wh = wh.at[:, out1:out_total].set(w2.astype(cdt))
    bh = jnp.zeros((1, out_pad), jnp.float32)
    bh = bh.at[:, :out1].set(b1.astype(jnp.float32))
    bh = bh.at[:, out1:out_total].set(b2.astype(jnp.float32))

    x_c = x.astype(cdt)
    ws_c = ws.astype(cdt)
    bs_c = bs.astype(jnp.float32)   # biases / accumulation stay fp32

    # --- batch tiling: full batch if small, else sublane-aligned tiles ---
    if B <= tile_b:
        tb = B                      # full-extent block is always legal
    else:
        tb = -(-min(tile_b, B) // 8) * 8
    grid = (pl.cdiv(B, tb),)

    itemsize = cdt.itemsize
    cost = pl.CostEstimate(
        flops=2 * B * (in_features * hidden + hidden * out_pad),
        transcendentals=0,
        bytes_accessed=((B * in_features + in_features * hidden
                         + hidden * out_pad) * itemsize
                        + (hidden + out_pad) * 4
                        + B * out_pad * 4),
    )

    y = pl.pallas_call(
        _multihead_kernel,
        out_shape=jax.ShapeDtypeStruct((B, out_pad), jnp.float32),
        grid=grid,
        in_specs=[
            pl.BlockSpec((tb, in_features), lambda i: (i, 0)),      # x: batch-tiled
            pl.BlockSpec((in_features, hidden), lambda i: (0, 0)),  # ws: resident
            pl.BlockSpec((1, hidden), lambda i: (0, 0)),            # bs: resident
            pl.BlockSpec((hidden, out_pad), lambda i: (0, 0)),      # fused W: resident
            pl.BlockSpec((1, out_pad), lambda i: (0, 0)),           # fused b: resident
        ],
        out_specs=pl.BlockSpec((tb, out_pad), lambda i: (i, 0)),
        compiler_params=pltpu.CompilerParams(
            dimension_semantics=("parallel",),      # shard batch across TCs (v7x)
            vmem_limit_bytes=32 * 1024 * 1024,
        ),
        cost_estimate=cost,
    )(x_c, ws_c, bs_c, wh, bh)

    return y[:, :out1], y[:, out1:out_total]


def init_params(key, in_features, out_features1, out_features2, hidden=128):
    """Deterministic synthetic init (Kaiming-uniform-like, nn.Linear bounds),
    weights stored transposed as [in, out], biases as [1, out]."""
    ks = jax.random.split(key, 6)

    def linear_init(kw, kb, fan_in, fan_out):
        bound = 1.0 / jnp.sqrt(fan_in)
        w = jax.random.uniform(kw, (fan_in, fan_out), jnp.float32, -bound, bound)
        b = jax.random.uniform(kb, (1, fan_out), jnp.float32, -bound, bound)
        return w, b

    ws, bs = linear_init(ks[0], ks[1], in_features, hidden)
    w1, b1 = linear_init(ks[2], ks[3], hidden, out_features1)
    w2, b2 = linear_init(ks[4], ks[5], hidden, out_features2)
    return ws, bs, w1, b1, w2, b2


def reference_forward(x, ws, bs, w1, b1, w2, b2):
    h = x @ ws + bs
    return h @ w1 + b1, h @ w2 + b2


if __name__ == "__main__":
    key = jax.random.PRNGKey(0)
    k_x, k_p, k_x2 = jax.random.split(key, 3)

    batch = 8
    in_features = 32
    out_features1 = 16
    out_features2 = 8

    x = jax.random.normal(k_x, (batch, in_features), jnp.float32)
    params = init_params(k_p, in_features, out_features1, out_features2)

    # --- fp32 path (default): tight correctness check vs. plain-JAX reference
    y1, y2 = multihead_forward(x, *params)
    jax.block_until_ready((y1, y2))
    r1, r2 = reference_forward(x, *params)
    assert y1.shape == (batch, out_features1)
    assert y2.shape == (batch, out_features2)
    assert jnp.allclose(y1, r1, atol=1e-5, rtol=1e-5)
    assert jnp.allclose(y2, r2, atol=1e-5, rtol=1e-5)

    # --- multi-tile / partial-tile path (grid over batch, parallel axis)
    big_b = 600
    xb = jax.random.normal(k_x2, (big_b, in_features), jnp.float32)
    yb1, yb2 = multihead_forward(xb, *params, tile_b=256)
    jax.block_until_ready((yb1, yb2))
    rb1, rb2 = reference_forward(xb, *params)
    assert jnp.allclose(yb1, rb1, atol=1e-5, rtol=1e-5)
    assert jnp.allclose(yb2, rb2, atol=1e-5, rtol=1e-5)

    # --- bf16 operand path (fp32 accumulation): v6e/v7x MXU fast path
    z1, z2 = multihead_forward(x, *params, compute_dtype=jnp.bfloat16)
    jax.block_until_ready((z1, z2))
    assert z1.shape == (batch, out_features1)
    assert z2.shape == (batch, out_features2)
    assert jnp.allclose(z1, r1, atol=1e-1, rtol=1e-1)
    assert jnp.allclose(z2, r2, atol=1e-1, rtol=1e-1)

    print("KERNEL_OK")
</pallas_src>

<mosaic_0001>
module attributes {stable_mosaic.version = 11 : i64} {
  func.func @_multihead_kernel(%arg0: i32, %arg1: memref<8x32xf32, #tpu.memory_space<vmem>>, %arg2: memref<32x128xf32, #tpu.memory_space<vmem>>, %arg3: memref<1x128xf32, #tpu.memory_space<vmem>>, %arg4: memref<128x128xf32, #tpu.memory_space<vmem>>, %arg5: memref<1x128xf32, #tpu.memory_space<vmem>>, %arg6: memref<8x128xf32, #tpu.memory_space<vmem>>) attributes {dimension_semantics = [#tpu.dimension_semantics<parallel>], iteration_bounds = array<i64: 1>, scalar_prefetch = 0 : i64, scratch_operands = 0 : i64, tpu.core_type = #tpu.core_type<tc>, window_params = [{transform_indices = @transform_0, window_bounds = array<i64: 8, 32>}, {pipeline_mode = #tpu.pipeline_mode<synchronous>, transform_indices = @transform_1, window_bounds = array<i64: 32, 128>}, {pipeline_mode = #tpu.pipeline_mode<synchronous>, transform_indices = @transform_2, window_bounds = array<i64: 1, 128>}, {pipeline_mode = #tpu.pipeline_mode<synchronous>, transform_indices = @transform_3, window_bounds = array<i64: 128, 128>}, {pipeline_mode = #tpu.pipeline_mode<synchronous>, transform_indices = @transform_4, window_bounds = array<i64: 1, 128>}, {transform_indices = @transform_5, window_bounds = array<i64: 8, 128>}]} {
    %c0 = arith.constant 0 : index
    %c0_0 = arith.constant 0 : index
    %0 = vector.load %arg1[%c0, %c0_0] : memref<8x32xf32, #tpu.memory_space<vmem>>, vector<8x32xf32>
    %c0_1 = arith.constant 0 : index
    %c0_2 = arith.constant 0 : index
    %1 = vector.load %arg2[%c0_1, %c0_2] : memref<32x128xf32, #tpu.memory_space<vmem>>, vector<32x128xf32>
    %cst = arith.constant dense<0.000000e+00> : vector<8x128xf32>
    %2 = tpu.matmul %0, %1, %cst {dimension_numbers = #tpu.dot_dimension_numbers<[1], [0], [0], [1], [0, 0, 1, 1], [], []>} : vector<8x32xf32>, vector<32x128xf32>, vector<8x128xf32> -> vector<8x128xf32>
    %c0_3 = arith.constant 0 : index
    %c0_4 = arith.constant 0 : index
    %3 = vector.load %arg3[%c0_3, %c0_4] : memref<1x128xf32, #tpu.memory_space<vmem>>, vector<1x128xf32>
    %4 = vector.broadcast %3 : vector<1x128xf32> to vector<8x128xf32>
    %5 = arith.addf %2, %4 : vector<8x128xf32>
    %c0_5 = arith.constant 0 : index
    %c0_6 = arith.constant 0 : index
    %6 = vector.load %arg4[%c0_5, %c0_6] : memref<128x128xf32, #tpu.memory_space<vmem>>, vector<128x128xf32>
    %cst_7 = arith.constant dense<0.000000e+00> : vector<8x128xf32>
    %7 = tpu.matmul %5, %6, %cst_7 {dimension_numbers = #tpu.dot_dimension_numbers<[1], [0], [0], [1], [0, 0, 1, 1], [], []>} : vector<8x128xf32>, vector<128x128xf32>, vector<8x128xf32> -> vector<8x128xf32>
    %c0_8 = arith.constant 0 : index
    %c0_9 = arith.constant 0 : index
    %8 = vector.load %arg5[%c0_8, %c0_9] : memref<1x128xf32, #tpu.memory_space<vmem>>, vector<1x128xf32>
    %9 = vector.broadcast %8 : vector<1x128xf32> to vector<8x128xf32>
    %10 = arith.addf %7, %9 : vector<8x128xf32>
    %c0_10 = arith.constant 0 : index
    %c0_11 = arith.constant 0 : index
    %11 = vector.load %arg6[%c0_10, %c0_11] : memref<8x128xf32, #tpu.memory_space<vmem>>, vector<8x128xf32>
    tpu.vector_store %arg6[%c0_10, %c0_11], %10 {strides = array<i32>} : memref<8x128xf32, #tpu.memory_space<vmem>>, vector<8x128xf32>,
    return
  }
  func.func @transform_0(%arg0: i32) -> (i32, i32) {
    %c0_i32 = arith.constant 0 : i32
    %c0_i32_0 = arith.constant 0 : i32
    return %arg0, %c0_i32 : i32, i32
  }
  func.func @transform_1(%arg0: i32) -> (i32, i32) {
    %c0_i32 = arith.constant 0 : i32
    %c0_i32_0 = arith.constant 0 : i32
    %c0_i32_1 = arith.constant 0 : i32
    return %c0_i32, %c0_i32_0 : i32, i32
  }
  func.func @transform_2(%arg0: i32) -> (i32, i32) {
    %c0_i32 = arith.constant 0 : i32
    %c0_i32_0 = arith.constant 0 : i32
    %c0_i32_1 = arith.constant 0 : i32
    return %c0_i32, %c0_i32_0 : i32, i32
  }
  func.func @transform_3(%arg0: i32) -> (i32, i32) {
    %c0_i32 = arith.constant 0 : i32
    %c0_i32_0 = arith.constant 0 : i32
    %c0_i32_1 = arith.constant 0 : i32
    return %c0_i32, %c0_i32_0 : i32, i32
  }
  func.func @transform_4(%arg0: i32) -> (i32, i32) {
    %c0_i32 = arith.constant 0 : i32
    %c0_i32_0 = arith.constant 0 : i32
    %c0_i32_1 = arith.constant 0 : i32
    return %c0_i32, %c0_i32_0 : i32, i32
  }
  func.func @transform_5(%arg0: i32) -> (i32, i32) {
    %c0_i32 = arith.constant 0 : i32
    %c0_i32_0 = arith.constant 0 : i32
    return %arg0, %c0_i32 : i32, i32
  }
}

</mosaic_0001>

<bundles_post_ra>
// kernel: tpu_custom_call.1
= control target key start
LH: loop header
LB: loop body
LE: loop exit
PB: predicated region body
PF: predicated region fallthrough
CT: control target
= control target key end

     0   :  { %10 = vsyncpa [#allocation3], 0  ;;  %s499_s0 = inlined_call_operand.hbm [shape: f32[8,32], index: 0, kind: input, shape index: {}]   ;;  %s500_s1 = inlined_call_operand.hbm [shape: f32[32,128], index: 1, kind: input, shape index: {}]   ;;  %s501_s2 = inlined_call_operand.vmem [shape: f32[1,128], index: 2, kind: input, shape index: {}]   ;;  %s502_s3 = inlined_call_operand.hbm [shape: f32[128,128], index: 3, kind: input, shape index: {}]   ;;  %s503_s4 = inlined_call_operand.vmem [shape: f32[1,128], index: 4, kind: input, shape index: {}]   ;;  %s504_s5 = inlined_call_operand.hbm [shape: f32[8,128], index: 5, kind: output, shape index: {}]  }
   0x1   :  { %11 = vsyncpa [#allocation6], 0 }
   0x2   :  { %12 = vsyncpa [#allocation4], 0  ;;  %s421_s18 = smov [#allocation5]  }
   0x3   :  { %s28_s19 = sshll.u32 %s421_s18, 4  ;;  %s29_s19 = int_to_ptr.vmem [resolvable:$true] %s28_s19 }
   0x4   :  { %s343_s20 = scalar_lea.vmem %s29_s19, 512  ;;  %p348_p1 = scmp.lt.s32.totalorder %s29_s19, %s29_s19 }
   0x5   :  { %p344_p0 = scmp.ne.s32.totalorder %s29_s19, %s343_s20  ;;  %p349_p2 = scmp.lt.s32.totalorder %s343_s20, %s343_s20 }
   0x7   :  { %p350_p3 = por %p349_p2, %p348_p1 }
   0x9   :  { %p351_p4 = pnand %p350_p3, %p344_p0 }
   0xb   :  { %354 = shalt.err (!%p351_p4)
}
   0xc   :  { %s422_s21 = smov 128   ;;  %s423_s22 = smov 8  }
   0xd   :  { %34 = dma.hbm_to_vmem [thread:$0]  %s500_s1, 512, %s29_s19, [#allocation6], %s422_s21, %s422_s21, %s423_s22  }
   0xe   :  { %s424_s25 = smov [#allocation2]   ;;  %s425_s27 = smov [#allocation7]  }
   0xf   :  { %s19_s26 = sshll.u32 %s424_s25, 4  ;;  %s42_s28 = sshll.u32 %s425_s27, 4  ;;  %s20_s26 = int_to_ptr.vmem [resolvable:$true] %s19_s26  ;;  %s43_s28 = int_to_ptr.vmem [resolvable:$true] %s42_s28 }
  0x10   :  { %s363_s29 = scalar_lea.vmem %s20_s26, 128  ;;  %p368_p6 = scmp.lt.s32.totalorder %s20_s26, %s20_s26 }
  0x11   :  { %p364_p5 = scmp.ne.s32.totalorder %s20_s26, %s363_s29  ;;  %p369_p7 = scmp.lt.s32.totalorder %s363_s29, %s363_s29 }
  0x13   :  { %p370_p8 = por %p369_p7, %p368_p6 }
  0x15   :  { %p371_p9 = pnand %p370_p8, %p364_p5 }
  0x17   :  { %374 = shalt.err (!%p371_p9)
}
  0x18   :  { %22 = dma.hbm_to_vmem [thread:$0]  %s499_s0, 128, %s20_s26, [#allocation3]  }
  0x19   :  { %s383_s7 = scalar_lea.vmem %s43_s28, 2048  ;;  %p388_p11 = scmp.lt.s32.totalorder %s43_s28, %s43_s28 }
  0x1a   :  { %p384_p10 = scmp.ne.s32.totalorder %s43_s28, %s383_s7  ;;  %p389_p12 = scmp.lt.s32.totalorder %s383_s7, %s383_s7 }
  0x1c   :  { %p390_p13 = por %p389_p12, %p388_p11 }
  0x1e   :  { %p391_p0 = pnand %p390_p13, %p384_p10 }
  0x20   :  { %394 = shalt.err (!%p391_p0)
}
  0x21   :  { %48 = dma.hbm_to_vmem [thread:$0]  %s502_s3, 2048, %s43_s28, [#allocation6], %s422_s21, %s422_s21, %s423_s22  }
  0x22   :  { %415 = dma.done.wait [#allocation3], 128  }
  0x23   :  { %416 = vsyncadd [#allocation3], 4294967168 }
  0x24   :  { %417 = dma.done.wait [#allocation6], 2560  }
  0x25   :  { %418 = vsyncadd [#allocation6], 4294964736  ;;  %v426_v0 = vmov 0.0   ;;  %vm427_vm0 = vmmov 0   ;;  %v64_v1 = vld [vmem:[#allocation5 + $0x18] sm:$0xff]  ;;  %v63_v2 = vld [vmem:[#allocation5 + $0x10] sm:$0xff] }
  0x26   :  { %281 = vmatprep.subr.mxu0 %v426_v0  ;;  %289 = vmatprep.mubr.msk.f32.mxu0 %vm427_vm0, %v426_v0  ;;  %v161_v3 = vld [vmem:[#allocation7 + $0x78] sm:$0xff]  ;;  %v62_v4 = vld [vmem:[#allocation5 + $0x8] sm:$0xff]  ;;  %v160_v5 = vld [vmem:[#allocation7 + $0x70] sm:$0xff]  ;;  %vm72_vm1 = vcmask 261120   ;;  %s428_s11 = smov [#allocation8]  }
  0x27   :  { %292 = vmatprep.subr.mxu1 %v426_v0  ;;  %324 = vmatprep.mubr.msk.f32.mxu1 %vm427_vm0, %v426_v0  ;;  %v159_v6 = vld [vmem:[#allocation7 + $0x68] sm:$0xff]  ;;  %v61_v7 = vld [vmem:[#allocation5] sm:$0xff]  ;;  %v60_v8 = vld [vmem:[#allocation2] sm:$0xff]  ;;  %s246_s12 = sshll.u32 %s428_s11, 4  ;;  %s247_s12 = int_to_ptr.vmem [resolvable:$true] %s246_s12 }
  0x28   :  { %282 = vmatpush3.msra.mxu0 %v64_v1  ;;  %293 = vmatpush3.msra.mxu1 %v161_v3  ;;  %v158_v9 = vld [vmem:[#allocation7 + $0x60] sm:$0xff]  ;;  %v157_v10 = vld [vmem:[#allocation7 + $0x58] sm:$0xff]  ;;  %v156_v11 = vld [vmem:[#allocation7 + $0x50] sm:$0xff]  ;;  %s395_s13 = scalar_lea.vmem %s247_s12, 128  ;;  %p400_p2 = scmp.lt.s32.totalorder %s247_s12, %s247_s12 }
  0x29   :  { %283 = vmatprep.subr.mxu0 %v426_v0  ;;  %294 = vmatprep.subr.mxu1 %v426_v0  ;;  %v155_v12 = vld [vmem:[#allocation7 + $0x48] sm:$0xff]  ;;  %v154_v13 = vld [vmem:[#allocation7 + $0x40] sm:$0xff]  ;;  %v153_v14 = vld [vmem:[#allocation7 + $0x38] sm:$0xff]  ;;  %p396_p1 = scmp.ne.s32.totalorder %s247_s12, %s395_s13  ;;  %p401_p3 = scmp.lt.s32.totalorder %s395_s13, %s395_s13 }
  0x2a   :  { %284 = vmatpush3.msra.mxu0 %v63_v2  ;;  %295 = vmatpush3.msra.mxu1 %v160_v5  ;;  %v152_v15 = vld [vmem:[#allocation7 + $0x30] sm:$0xff]  ;;  %v151_v16 = vld [vmem:[#allocation7 + $0x28] sm:$0xff]  ;;  %v150_v17 = vld [vmem:[#allocation7 + $0x20] sm:$0xff] }
  0x2b   :  { %285 = vmatprep.subr.mxu0 %v426_v0  ;;  %296 = vmatprep.subr.mxu1 %v426_v0  ;;  %v149_v18 = vld [vmem:[#allocation7 + $0x18] sm:$0xff]  ;;  %v148_v19 = vld [vmem:[#allocation7 + $0x10] sm:$0xff]  ;;  %v147_v20 = vld [vmem:[#allocation7 + $0x8] sm:$0xff]  ;;  %p402_p4 = por %p401_p3, %p400_p2 }
  0x2c   :  { %286 = vmatpush3.msra.mxu0 %v62_v4  ;;  %297 = vmatpush3.msra.mxu1 %v159_v6  ;;  %v146_v21 = vld [vmem:[#allocation7] sm:$0xff]  ;;  %v256_v22 = vld [vmem:[%s501_s2] ss:$0 sm:$0xff] }
  0x2d   :  { %287 = vmatprep.subr.mxu0 %v426_v0  ;;  %298 = vmatprep.subr.mxu1 %v426_v0  ;;  %v258_v26 = vld [vmem:[%s503_s4] ss:$0 sm:$0xff]  ;;  %p403_p5 = pnand %p402_p4, %p396_p1 }
  0x2e   :  { %288 = vmatpush3.msra.mxu0 %v61_v7  ;;  %299 = vmatpush3.msra.mxu1 %v158_v9 }
  0x2f   :  { %290 = vmatmul.mubr.msk.f32.vlgmr.msra.gmra.mxu0 %vm72_vm1, %v60_v8  ;;  %300 = vmatprep.subr.mxu1 %v426_v0 }
  0x30   :  { %301 = vmatpush3.msra.mxu1 %v157_v10 }
  0x31   :  { %302 = vmatprep.subr.mxu1 %v426_v0 }
  0x32   :  { %303 = vmatpush3.msra.mxu1 %v156_v11 }
  0x33   :  { %304 = vmatprep.subr.mxu1 %v426_v0 }
  0x34   :  { %305 = vmatpush3.msra.mxu1 %v155_v12 }
  0x35   :  { %306 = vmatprep.subr.mxu1 %v426_v0 }
  0x36   :  { %307 = vmatpush3.msra.mxu1 %v154_v13 }
  0x37   :  { %308 = vmatprep.subr.mxu1 %v426_v0 }
  0x38   :  { %309 = vmatpush3.msra.mxu1 %v153_v14 }
  0x39   :  { %310 = vmatprep.subr.mxu1 %v426_v0 }
  0x3a   :  { %311 = vmatpush3.msra.mxu1 %v152_v15 }
  0x3b   :  { %312 = vmatprep.subr.mxu1 %v426_v0 }
  0x3c   :  { %313 = vmatpush3.msra.mxu1 %v151_v16 }
  0x3d   :  { %314 = vmatprep.subr.mxu1 %v426_v0 }
  0x3e   :  { %315 = vmatpush3.msra.mxu1 %v150_v17 }
  0x3f   :  { %316 = vmatprep.subr.mxu1 %v426_v0 }
  0x40   :  { %317 = vmatpush3.msra.mxu1 %v149_v18 }
  0x41   :  { %318 = vmatprep.subr.mxu1 %v426_v0 }
  0x42   :  { %319 = vmatpush3.msra.mxu1 %v148_v19 }
  0x43   :  { %320 = vmatprep.subr.mxu1 %v426_v0 }
  0x44   :  { %321 = vmatpush3.msra.mxu1 %v147_v20 }
  0x45   :  { %322 = vmatprep.subr.mxu1 %v426_v0 }
  0x46   :  { %323 = vmatpush3.msra.mxu1 %v146_v21 }
  0xef   :  { %v142_v23 = vpop.f32.mrf.mxu0 }
  0xf0   :  { %v143_v24 = vadd.f32 %v256_v22, %v142_v23 }
  0xf1   :  { %v291_v25 = vpop.f32.mrf.mxu0 }
  0xf2   :  { %325 = vmatmul.mubr.f32.vlgmr.msra.gmra.mxu1 %v143_v24 }
 0x1b2   :  { %v235_v27 = vpop.f32.mrf.mxu1 }
 0x1b3   :  { %v236_v28 = vadd.f32 %v258_v26, %v235_v27 }
 0x1b4   :  { %v326_v29 = vpop.f32.mrf.mxu1 }
 0x1b5   :  { %239 = vst [vmem:[#allocation8] sm:$0xff] %v236_v28 }
 0x1b6   :  { %406 = shalt.err (!%p403_p5)
}
 0x1b7   :  { %249 = dma.vmem_to_hbm [thread:$0]  %s247_s12, 128, %s504_s5, [#allocation4]  }
 0x1b8   :  { %419 = dma.done.wait [#allocation4], 128  }
 0x1b9   :  { %420 = vsyncadd [#allocation4], 4294967168 }
 0x1ba   :  { %253 = vsyncpa [#allocation3], 1 }
 0x1bb   :  { %254 = vsyncpa [#allocation6], 1 }
 0x1bc   :  { %255 = vsyncpa [#allocation4], 1 }

</bundles_post_ra>
